<compile_context>
chip_gen: v7x
topology: tpu7x:2x2x1
jax: 0.10.0
libtpu: 0.0.40
codegen_flags: <defaults>
</compile_context>

<pallas_src>
import jax
import jax.numpy as jnp
from jax.experimental import pallas as pl
from jax.experimental.pallas import tpu as pltpu

_LANES = 128
# Below this many weight elements the whole evaluation is a single tiny XLA
# fusion; a Pallas custom call would only add dispatch overhead and block
# fusion with the producing softmax/sigmoid.
_PALLAS_MIN_ELEMS = 1 << 16
_MAX_BLOCK_ROWS = 16384  # conservative cap (~8 MiB f32 per input block)


def _round_up(x, m):
    return (x + m - 1) // m * m


def _vmem_limit_and_budget():
    """Generation-aware scoped-VMEM limit and pipeline-buffer budget (bytes)."""
    try:
        phys = pltpu.get_tpu_info().vmem_capacity_bytes  # v7x 64MiB, v5e/v6e 128MiB
    except Exception:
        phys = 64 << 20  # assume the smallest current generation (v7x)
    limit = max(24 << 20, min(phys - (16 << 20), 96 << 20))
    return limit, (limit * 3) // 4


def _shield_circuit_kernel(a_ref, g_ref, s_ref, sa_ref, sn_ref):
    """Evaluate the compiled SDD circuit (probability semiring), lane-dense.

    a_ref/g_ref/sa_ref: (tr, 128) blocks of the packed (B*N/128, 128) view,
    each 128-lane row holding 128/N complete batch rows.  s_ref is the
    (128, 128/N) segmented-sum matrix; sn_ref is the (tr, 128/N) safe_next
    block (flat order == batch order).
    """
    a = a_ref[...].astype(jnp.float32)            # P(action = i)
    g = g_ref[...].astype(jnp.float32)            # P(ghost in direction i)
    # safe_action(A) :- action(A), \+ ghost(A)   -> times + negate (VPU)
    sa = a * (1.0 - g)
    sa_ref[...] = sa.astype(sa_ref.dtype)
    # safe_next :- safe_action(_)  (disjoint sum over the N actions of each
    # batch row) -> segmented sum as a small matmul on the idle MXU.
    sn_ref[...] = jnp.dot(sa, s_ref[...],
                          preferred_element_type=jnp.float32).astype(sn_ref.dtype)


def _evaluate_circuit_reference(action, ghost):
    """Pure-jnp circuit evaluation (used for tiny shapes and fallbacks)."""
    sa = action.astype(jnp.float32) * (1.0 - ghost.astype(jnp.float32))
    sn = jnp.sum(sa, axis=-1, keepdims=True)
    return sa.astype(action.dtype), sn.astype(action.dtype)


def _evaluate_circuit_pallas(action, ghost, *, block_rows=None):
    """action, ghost: (B, N) probabilities -> (safe_action (B,N), safe_next (B,1))."""
    B, N = action.shape
    dtype = action.dtype
    if N > _LANES or _LANES % N != 0:
        # TODO(synk): circuits whose action arity does not divide the 128-lane
        # vreg width fall back to the fused XLA expression.
        return _evaluate_circuit_reference(action, ghost)

    isz = jnp.dtype(dtype).itemsize
    sub = 8 * max(1, 4 // isz)            # sublane multiple (8 f32 / 16 bf16)
    G = _LANES // N                       # batch rows per 128-lane group

    # Pad the batch so the flat view packs into full (sub, 128) tiles.  The
    # reshape of a contiguous row-major array is a free bitcast (no HBM copy).
    Bp = _round_up(B, sub * G)
    if Bp != B:
        action = jnp.pad(action, ((0, Bp - B), (0, 0)))
        ghost = jnp.pad(ghost, ((0, Bp - B), (0, 0)))
    R = Bp // G                           # packed rows
    a_p = action.reshape(R, _LANES)
    g_p = ghost.reshape(R, _LANES)

    # Segmented-sum matrix: S[l, g] = 1 iff lane l belongs to batch row g of
    # its 128-lane group (constant, 128*G*4 bytes, DMAed once).
    seg = jnp.arange(_LANES)[:, None] // N == jnp.arange(G)[None, :]
    S = seg.astype(jnp.float32)

    vmem_limit, budget = _vmem_limit_and_budget()
    # Double-buffered VMEM bytes per packed row: a + g + sa (+ sn).
    per_row = 2 * (3 * _LANES + G) * isz
    if block_rows is None:
        tr = (budget // per_row) // sub * sub
        tr = max(sub, min(tr, _MAX_BLOCK_ROWS))
        if R >= 2048:
            # Keep >= 2 lane-blocks so both v7x TensorCores get a share.
            tr = min(tr, _round_up(pl.cdiv(R, 2), sub))
    else:
        tr = max(sub, _round_up(block_rows, sub))
    tr = min(tr, R)
    grid = (pl.cdiv(R, tr),)              # ragged last block is masked by Pallas

    sa_p, sn_p = pl.pallas_call(
        _shield_circuit_kernel,
        out_shape=(
            jax.ShapeDtypeStruct((R, _LANES), dtype),   # packed safe_action
            jax.ShapeDtypeStruct((R, G), dtype),        # packed safe_next
        ),
        grid=grid,
        in_specs=[
            pl.BlockSpec((tr, _LANES), lambda i: (i, 0)),
            pl.BlockSpec((tr, _LANES), lambda i: (i, 0)),
            pl.BlockSpec((_LANES, G), lambda i: (0, 0)),  # constant block index
        ],
        out_specs=(
            pl.BlockSpec((tr, _LANES), lambda i: (i, 0)),
            pl.BlockSpec((tr, G), lambda i: (i, 0)),
        ),
        compiler_params=pltpu.CompilerParams(
            dimension_semantics=("parallel",),
            vmem_limit_bytes=vmem_limit,
        ),
    )(a_p, g_p, S)

    # Free reshapes back to the caller's layout; slice off padding if any.
    safe_action = sa_p.reshape(Bp, N)
    safe_next = sn_p.reshape(Bp, 1)
    if Bp != B:
        safe_action = safe_action[:B]
        safe_next = safe_next[:B]
    return safe_action, safe_next


def evaluate_circuit(action, ghost, use_pallas=None):
    if action.ndim != 2 or ghost.shape != action.shape:
        raise ValueError("expected matching (B, N) weight tensors, got %r / %r"
                         % (action.shape, ghost.shape))
    if use_pallas is None:
        use_pallas = action.shape[0] * action.shape[1] >= _PALLAS_MIN_ELEMS
    if use_pallas:
        return _evaluate_circuit_pallas(action, ghost)
    return _evaluate_circuit_reference(action, ghost)


class DeepProbLogLayer:
    """JAX/Pallas re-implementation of the DeepProbLog layer forward pass for
    the fixed shield program documented above.

    forward(x): x is a dict {"action": (B, N), "ghost": (B, N)} of
    probabilities.  Returns a dict of per-query-functor tensors concatenated
    along the last dim ({"safe_action": (B, N), "safe_next": (B, 1)}), or the
    single selected tensor if `single_output` is set.
    """

    def __init__(self, program=None, queries=(), evidences=(), single_output=None,
                 use_pallas=None):
        query = "\n".join("query(%s)." % q for q in queries)
        evidence = "\n".join("evidence(%s)." % e for e in evidences)
        self.program = "\n\n".join([program or "", evidence, query])
        self.queries = list(queries)
        self.evidences = list(evidences)
        self.single_output = single_output
        self.use_pallas = use_pallas
        # TODO(synk): ProbLog -> LogicFormula -> LogicDAG -> SDD compilation is
        # symbolic (PySDD) and has no Pallas equivalent; the compiled circuit
        # for the canonical PLS shield program is hard-coded in
        # _shield_circuit_kernel / _evaluate_circuit_*.

    def forward(self, x):
        if self.single_output is not None and not isinstance(x, dict):
            # Mirrors semiring.set_weights({single_output: x}) in the reference.
            # TODO(synk): a bare tensor can only populate one functor's weights;
            # the hard-coded two-input shield circuit still needs both, so this
            # mode only works when that functor supplies everything the circuit
            # reads (not the case for the shield program).
            x = {self.single_output: x}
        if not isinstance(x, dict) or "action" not in x or "ghost" not in x:
            raise ValueError(
                "The hard-coded shield circuit needs weights for both 'action' "
                "and 'ghost'; got %r (generic program->SDD evaluation is not "
                "translatable to Pallas)."
                % (sorted(x.keys()) if isinstance(x, dict) else type(x),))
        safe_action, safe_next = evaluate_circuit(
            x["action"], x["ghost"], use_pallas=self.use_pallas)
        tensorial = {"safe_action": safe_action, "safe_next": safe_next}
        if self.single_output:
            return tensorial[self.single_output]
        return tensorial

    __call__ = forward


if __name__ == "__main__":
    key = jax.random.PRNGKey(0)
    ks = jax.random.split(key, 4)
    N = 4
    program = ("safe_action(A) :- action(A), \\+ ghost(A). "
               "safe_next :- safe_action(_).")
    queries = ["safe_action(_)", "safe_next"]

    # --- canonical small shield shapes: default path is one fused XLA expr ---
    B = 8
    action = jax.nn.softmax(jax.random.normal(ks[0], (B, N), jnp.float32), axis=-1)
    ghost = jax.nn.sigmoid(jax.random.normal(ks[1], (B, N), jnp.float32))
    ref_sa, ref_sn = _evaluate_circuit_reference(action, ghost)

    layer = DeepProbLogLayer(program=program, queries=queries)
    out = layer({"action": action, "ghost": ghost})
    jax.block_until_ready(out)
    assert out["safe_action"].shape == (B, N) and out["safe_next"].shape == (B, 1)
    assert jnp.allclose(out["safe_action"], ref_sa, atol=1e-6)
    assert jnp.allclose(out["safe_next"], ref_sn, atol=1e-6)

    # single_output selection with dict weights
    layer_single = DeepProbLogLayer(program=program, queries=queries,
                                    single_output="safe_next")
    out_single = layer_single({"action": action, "ghost": ghost})
    jax.block_until_ready(out_single)
    assert jnp.allclose(out_single, ref_sn, atol=1e-6)

    # --- Pallas path forced at the same small shapes (exercises batch padding) ---
    layer_pl = DeepProbLogLayer(program=program, queries=queries, use_pallas=True)
    out_pl = layer_pl({"action": action, "ghost": ghost})
    jax.block_until_ready(out_pl)
    assert jnp.allclose(out_pl["safe_action"], ref_sa, atol=1e-6)
    assert jnp.allclose(out_pl["safe_next"], ref_sn, atol=1e-6)

    # --- ragged batch + multi-step cdiv grid (small block_rows to force >1 step) ---
    B2 = 1000  # not a multiple of 256 -> exercises padding + masked last block
    a2 = jax.nn.softmax(jax.random.normal(ks[2], (B2, N), jnp.float32), axis=-1)
    g2 = jax.nn.sigmoid(jax.random.normal(ks[3], (B2, N), jnp.float32))
    sa2, sn2 = _evaluate_circuit_pallas(a2, g2, block_rows=24)
    jax.block_until_ready((sa2, sn2))
    r_sa2, r_sn2 = _evaluate_circuit_reference(a2, g2)
    assert jnp.allclose(sa2, r_sa2, atol=1e-6)
    assert jnp.allclose(sn2, r_sn2, atol=1e-6)

    # --- bf16 parity (product is computed in f32 in-kernel; stores round) ---
    a3, g3 = a2.astype(jnp.bfloat16), g2.astype(jnp.bfloat16)
    sa3, sn3 = _evaluate_circuit_pallas(a3, g3)
    jax.block_until_ready((sa3, sn3))
    r_sa3, r_sn3 = _evaluate_circuit_reference(a3, g3)
    assert jnp.allclose(sa3.astype(jnp.float32), r_sa3.astype(jnp.float32), atol=1e-2)
    assert jnp.allclose(sn3.astype(jnp.float32), r_sn3.astype(jnp.float32), atol=1e-2)

    print("KERNEL_OK")
</pallas_src>

<mosaic_0001>
module attributes {stable_mosaic.version = 11 : i64} {
  func.func @_shield_circuit_kernel(%arg0: i32, %arg1: memref<8x128xf32, #tpu.memory_space<vmem>>, %arg2: memref<8x128xf32, #tpu.memory_space<vmem>>, %arg3: memref<128x32xf32, #tpu.memory_space<vmem>>, %arg4: memref<8x128xf32, #tpu.memory_space<vmem>>, %arg5: memref<8x32xf32, #tpu.memory_space<vmem>>) attributes {dimension_semantics = [#tpu.dimension_semantics<parallel>], iteration_bounds = array<i64: 1>, scalar_prefetch = 0 : i64, scratch_operands = 0 : i64, tpu.core_type = #tpu.core_type<tc>, window_params = [{transform_indices = @transform_0, window_bounds = array<i64: 8, 128>}, {transform_indices = @transform_1, window_bounds = array<i64: 8, 128>}, {pipeline_mode = #tpu.pipeline_mode<synchronous>, transform_indices = @transform_2, window_bounds = array<i64: 128, 32>}, {transform_indices = @transform_3, window_bounds = array<i64: 8, 128>}, {transform_indices = @transform_4, window_bounds = array<i64: 8, 32>}]} {
    %c0 = arith.constant 0 : index
    %c0_0 = arith.constant 0 : index
    %0 = vector.load %arg1[%c0, %c0_0] : memref<8x128xf32, #tpu.memory_space<vmem>>, vector<8x128xf32>
    %c0_1 = arith.constant 0 : index
    %c0_2 = arith.constant 0 : index
    %1 = vector.load %arg2[%c0_1, %c0_2] : memref<8x128xf32, #tpu.memory_space<vmem>>, vector<8x128xf32>
    %cst = arith.constant 1.000000e+00 : f32
    %2 = vector.broadcast %cst : f32 to vector<8x128xf32>
    %3 = arith.subf %2, %1 : vector<8x128xf32>
    %4 = arith.mulf %0, %3 : vector<8x128xf32>
    %c0_3 = arith.constant 0 : index
    %c0_4 = arith.constant 0 : index
    %5 = vector.load %arg4[%c0_3, %c0_4] : memref<8x128xf32, #tpu.memory_space<vmem>>, vector<8x128xf32>
    tpu.vector_store %arg4[%c0_3, %c0_4], %4 {strides = array<i32>} : memref<8x128xf32, #tpu.memory_space<vmem>>, vector<8x128xf32>,
    %c0_5 = arith.constant 0 : index
    %c0_6 = arith.constant 0 : index
    %6 = vector.load %arg3[%c0_5, %c0_6] : memref<128x32xf32, #tpu.memory_space<vmem>>, vector<128x32xf32>
    %cst_7 = arith.constant dense<0.000000e+00> : vector<8x32xf32>
    %7 = tpu.matmul %4, %6, %cst_7 {dimension_numbers = #tpu.dot_dimension_numbers<[1], [0], [0], [1], [0, 0, 1, 1], [], []>} : vector<8x128xf32>, vector<128x32xf32>, vector<8x32xf32> -> vector<8x32xf32>
    %c0_8 = arith.constant 0 : index
    %c0_9 = arith.constant 0 : index
    %8 = vector.load %arg5[%c0_8, %c0_9] : memref<8x32xf32, #tpu.memory_space<vmem>>, vector<8x32xf32>
    tpu.vector_store %arg5[%c0_8, %c0_9], %7 {strides = array<i32>} : memref<8x32xf32, #tpu.memory_space<vmem>>, vector<8x32xf32>,
    return
  }
  func.func @transform_0(%arg0: i32) -> (i32, i32) {
    %c0_i32 = arith.constant 0 : i32
    %c0_i32_0 = arith.constant 0 : i32
    return %arg0, %c0_i32 : i32, i32
  }
  func.func @transform_1(%arg0: i32) -> (i32, i32) {
    %c0_i32 = arith.constant 0 : i32
    %c0_i32_0 = arith.constant 0 : i32
    return %arg0, %c0_i32 : i32, i32
  }
  func.func @transform_2(%arg0: i32) -> (i32, i32) {
    %c0_i32 = arith.constant 0 : i32
    %c0_i32_0 = arith.constant 0 : i32
    %c0_i32_1 = arith.constant 0 : i32
    return %c0_i32, %c0_i32_0 : i32, i32
  }
  func.func @transform_3(%arg0: i32) -> (i32, i32) {
    %c0_i32 = arith.constant 0 : i32
    %c0_i32_0 = arith.constant 0 : i32
    return %arg0, %c0_i32 : i32, i32
  }
  func.func @transform_4(%arg0: i32) -> (i32, i32) {
    %c0_i32 = arith.constant 0 : i32
    %c0_i32_0 = arith.constant 0 : i32
    return %arg0, %c0_i32 : i32, i32
  }
}

</mosaic_0001>

<bundles_post_ra>
// kernel: tpu_custom_call.1
= control target key start
LH: loop header
LB: loop body
LE: loop exit
PB: predicated region body
PF: predicated region fallthrough
CT: control target
= control target key end

     0   :  { %10 = vsyncpa [#allocation3], 0  ;;  %v268_v3 = vmov 0.0|0.0   ;;  %vm269_vm0 = vmmov 0   ;;  %v270_v6 = vmov 0.0   ;;  %s376_s0 = inlined_call_operand.vmem [shape: f32[8,128], index: 0, kind: input, shape index: {}]   ;;  %s377_s1 = inlined_call_operand.vmem [shape: f32[8,128], index: 1, kind: input, shape index: {}]   ;;  %s378_s2 = inlined_call_operand.vmem [shape: f32[128,32], index: 2, kind: input, shape index: {}]   ;;  %s379_s3 = inlined_call_operand.hbm [shape: f32[8,128], index: 3, kind: output, shape index: {0}]   ;;  %s380_s4 = inlined_call_operand.hbm [shape: f32[8,32], index: 4, kind: output, shape index: {1}]  }
   0x1   :  { %v23_v0 = vld [vmem:[%s378_s2] sm:$0xff]  ;;  %v24_v1 = vld [vmem:[%s378_s2 + $0x8] sm:$0xff]  ;;  %v25_v2 = vld [vmem:[%s378_s2 + $0x10] sm:$0xff]  ;;  %191 = vmatprep.subr.bf16.mxu0 %v268_v3  ;;  %188 = vmatprep.mubr.msk.f32.mxu0 %vm269_vm0, %v270_v6 }
   0x2   :  { %v192_v4 = vpack.c.bf16 %v24_v1, %v23_v0  ;;  %v26_v5 = vld [vmem:[%s378_s2 + $0x18] sm:$0xff]  ;;  %v27_v8 = vld [vmem:[%s378_s2 + $0x20] sm:$0xff]  ;;  %v28_v9 = vld [vmem:[%s378_s2 + $0x28] sm:$0xff] }
   0x3   :  { %v195_v7 = vpack.c.bf16 %v26_v5, %v25_v2  ;;  %v18_v10 = vld [vmem:[%s376_s0] sm:$0xff] }
   0x4   :  { %193 = vmatpush3.bf16.msra.mxu0 %v192_v4  ;;  %v19_v11 = vld [vmem:[%s377_s1] sm:$0xff] }
   0x5   :  { %194 = vmatprep.subr.bf16.mxu0 %v268_v3  ;;  %v20_v12 = vsub.f32 1.0, %v19_v11 }
   0x6   :  { %11 = vsyncpa [#allocation5], 0  ;;  %v198_v13 = vpack.c.bf16 %v28_v9, %v27_v8  ;;  %v29_v14 = vld [vmem:[%s378_s2 + $0x30] sm:$0xff]  ;;  %v30_v15 = vld [vmem:[%s378_s2 + $0x38] sm:$0xff]  ;;  %s271_s23 = smov [#allocation2]  }
   0x7   :  { %v21_v16 = vmul.f32 %v20_v12, %v18_v10  ;;  %v201_v17 = vpack.c.bf16 %v30_v15, %v29_v14  ;;  %v31_v18 = vld [vmem:[%s378_s2 + $0x40] sm:$0xff]  ;;  %v32_v19 = vld [vmem:[%s378_s2 + $0x48] sm:$0xff]  ;;  %v33_v21 = vld [vmem:[%s378_s2 + $0x50] sm:$0xff]  ;;  %s117_s24 = sshll.u32 %s271_s23, 4  ;;  %s118_s24 = int_to_ptr.vmem [resolvable:$true] %s117_s24 }
   0x8   :  { %196 = vmatpush3.bf16.msra.mxu0 %v195_v7  ;;  %v204_v20 = vpack.c.bf16 %v32_v19, %v31_v18  ;;  %v34_v22 = vld [vmem:[%s378_s2 + $0x58] sm:$0xff]  ;;  %v35_v24 = vld [vmem:[%s378_s2 + $0x60] sm:$0xff]  ;;  %v36_v25 = vld [vmem:[%s378_s2 + $0x68] sm:$0xff]  ;;  %s220_s25 = scalar_lea.vmem %s118_s24, 128  ;;  %p225_p1 = scmp.lt.s32.totalorder %s118_s24, %s118_s24 }
   0x9   :  { %197 = vmatprep.subr.bf16.mxu0 %v268_v3  ;;  %22 = vst [vmem:[#allocation2] sm:$0xff] %v21_v16  ;;  %v207_v23 = vpack.c.bf16 %v34_v22, %v33_v21  ;;  %v210_v26 = vpack.c.bf16 %v36_v25, %v35_v24  ;;  %v37_v27 = vld [vmem:[%s378_s2 + $0x70] sm:$0xff]  ;;  %v38_v28 = vld [vmem:[%s378_s2 + $0x78] sm:$0xff]  ;;  %p221_p0 = scmp.ne.s32.totalorder %s118_s24, %s220_s25  ;;  %p226_p2 = scmp.lt.s32.totalorder %s220_s25, %s220_s25 }
   0xa   :  { %v213_v29 = vpack.c.bf16 %v38_v28, %v37_v27 }
   0xb   :  { %p227_p3 = por %p226_p2, %p225_p1 }
   0xc   :  { %199 = vmatpush3.bf16.msra.mxu0 %v198_v13 }
   0xd   :  { %200 = vmatprep.subr.bf16.mxu0 %v268_v3  ;;  %p228_p4 = pnand %p227_p3, %p221_p0 }
  0x10   :  { %202 = vmatpush3.bf16.msra.mxu0 %v201_v17 }
  0x11   :  { %203 = vmatprep.subr.bf16.mxu0 %v268_v3 }
  0x14   :  { %205 = vmatpush3.bf16.msra.mxu0 %v204_v20 }
  0x15   :  { %206 = vmatprep.subr.bf16.mxu0 %v268_v3 }
  0x18   :  { %208 = vmatpush3.bf16.msra.mxu0 %v207_v23 }
  0x19   :  { %209 = vmatprep.subr.bf16.mxu0 %v268_v3 }
  0x1c   :  { %211 = vmatpush3.bf16.msra.mxu0 %v210_v26 }
  0x1d   :  { %212 = vmatprep.subr.bf16.mxu0 %v268_v3 }
  0x20   :  { %214 = vmatpush3.bf16.msra.mxu0 %v213_v29 }
  0x23   :  { %189 = vmatmul.mubr.f32.vlgmr.msra.gmra.mrb[0].mxu0 %v21_v16 }
  0x24   :  { %231 = shalt.err (!%p228_p4)
}
  0x25   :  { %s232_s28 = scalar_lea.hbm %s379_s3, 128 }
  0x26   :  { %p233_p5 = scmp.ne.s32.totalorder %s379_s3, %s232_s28  ;;  %p236_p6 = scmp.lt.u32.totalorder %s232_s28, %s379_s3 }
  0x28   :  { %p238_p7 = pnand %p236_p6, %p233_p5 }
  0x2a   :  { %241 = shalt.err (!%p238_p7)
}
  0x2b   :  { %120 = dma.vmem_to_hbm [thread:$0]  %s118_s24, 128, %s379_s3, [#allocation3]   ;;  %vm109_vm1 = vcmask 261120  }
  0x2c   :  { %s272_s8 = smov [#allocation4]  }
  0x2d   :  { %s127_s0 = sshll.u32 %s272_s8, 4  ;;  %s128_s0 = int_to_ptr.vmem [resolvable:$true] %s127_s0 }
  0x2e   :  { %s242_s1 = scalar_lea.vmem %s128_s0, 128  ;;  %p247_p9 = scmp.lt.s32.totalorder %s128_s0, %s128_s0 }
  0x2f   :  { %p243_p8 = scmp.ne.s32.totalorder %s128_s0, %s242_s1  ;;  %p248_p10 = scmp.lt.s32.totalorder %s242_s1, %s242_s1 }
  0x31   :  { %p249_p11 = por %p248_p10, %p247_p9 }
  0x33   :  { %p250_p12 = pnand %p249_p11, %p243_p8 }
  0xf6   :  { %v105_v30 = vpop.f32.mrb[0].mxu0 }
  0xf7   :  { %110 = vst.msk [vmem:[#allocation4] sm:$0xff] %vm109_vm1, %v105_v30  ;;  %v190_v31 = vpop.f32.mrb[1].mxu0 }
  0xf8   :  { %253 = shalt.err (!%p250_p12)
}
  0xf9   :  { %s254_s11 = scalar_lea.hbm %s380_s4, 128 }
  0xfa   :  { %p255_p13 = scmp.ne.s32.totalorder %s380_s4, %s254_s11  ;;  %p258_p0 = scmp.lt.u32.totalorder %s254_s11, %s380_s4 }
  0xfc   :  { %p260_p1 = pnand %p258_p0, %p255_p13 }
  0xfe   :  { %263 = shalt.err (!%p260_p1)
}
  0xff   :  { %130 = dma.vmem_to_hbm [thread:$0]  %s128_s0, 128, %s380_s4, [#allocation5]  }
 0x100   :  { %264 = dma.done.wait [#allocation3], 128  }
 0x101   :  { %265 = vsyncadd [#allocation3], 4294967168 }
 0x102   :  { %266 = dma.done.wait [#allocation5], 128  }
 0x103   :  { %267 = vsyncadd [#allocation5], 4294967168 }
 0x104   :  { %137 = vsyncpa [#allocation3], 1 }
 0x105   :  { %138 = vsyncpa [#allocation5], 1 }

</bundles_post_ra>
